<compile_context>
chip_gen: v6e
topology: v6e:2x2x1
jax: 0.10.0
libtpu: 0.0.40
codegen_flags: <defaults>
</compile_context>

<pallas_src>
import jax
import jax.numpy as jnp
from jax import lax
from jax.experimental import pallas as pl
from jax.experimental.pallas import tpu as pltpu

EPS = 1e-12
LANE = 128
# Hard ceiling for the estimated per-step VMEM footprint (safe on every
# generation: v7x has only 64 MiB physical VMEM per TensorCore).
_VMEM_HARD_CAP = 56 * 1024 * 1024


def _cdiv(a, b):
    return -(-a // b)


def _l2_normalize_kernel(x_ref, o_ref):
    # Block shape: (bn, C, T).  The channel reduction (axis=1) is entirely
    # inside the block; every (n, hw) column is an independent problem.
    x = x_ref[...]
    xf = x.astype(jnp.float32)                           # f32 accumulation
    sumsq = jnp.sum(xf * xf, axis=1, keepdims=True)      # (bn, 1, T)
    # out = x / max(||x||_2, eps)  ==  x * min(rsqrt(sum x^2), 1/eps)
    # NOTE: in a ragged final block the out-of-bounds lanes may contain
    # garbage and rsqrt of it can be inf/NaN.  That is harmless: those stores
    # are masked by Pallas, and the reduction axis (C) is always full so
    # in-bounds lanes are never polluted.  Do not "fix" this with padding.
    inv = jnp.minimum(lax.rsqrt(sumsq), jnp.float32(1.0 / EPS))
    # Multiply in f32 and cast once (matches torch / the f32 reference even
    # for bf16 inputs); free, this kernel is HBM-bandwidth bound.
    o_ref[...] = (xf * inv).astype(o_ref.dtype)


def _device_info():
    """(vmem_capacity_bytes, num_tensorcores) with conservative fallbacks."""
    vmem = 64 * 1024 * 1024
    num_tc = 1
    try:
        info = pltpu.get_tpu_info()
        vmem = int(getattr(info, "vmem_capacity_bytes", vmem))
    except Exception:
        pass
    try:
        kind = jax.devices()[0].device_kind.lower()
        if "v7" in kind:        # v7x: 2 TensorCores/chip, 64 MiB VMEM per TC
            num_tc = 2
    except Exception:
        pass
    return vmem, num_tc


def _plan_tiles(n, c, hw, num_tc, per_buf_f32):
    """Pick (bn, tile_hw): samples and HW elements per block.

    Budgeting is in f32-equivalent bytes because the in-kernel temporaries
    (xf, xf*xf, xf*inv) are f32 regardless of the input dtype.
    """
    full_f32 = n * c * hw * 4
    if full_f32 <= per_buf_f32:
        # Whole tensor fits one block.  On single-TC chips (v5e/v6e) the grid
        # is a serial loop, so one big block is strictly best.  On 2-TC chips
        # keep >= 2 parallel grid points so both TensorCores get work.
        if num_tc >= 2:
            if n >= 2:
                return _cdiv(n, 2), hw
            if hw > LANE:
                return n, _cdiv(_cdiv(hw, LANE), 2) * LANE
        return n, hw
    # Tile along HW (one sample per block).  tile_hw is a multiple of 128 so
    # the last block dim is lane-dense; C (full extent) is exempt from the
    # sublane rule.  The ragged final block (if any) is masked by Pallas.
    max_hw = per_buf_f32 // (c * 4)
    tile_hw = max(LANE, (max_hw // LANE) * LANE)
    if tile_hw >= hw:
        tile_hw = hw            # full extent -> exempt, no masking at all
    return 1, tile_hw


def normalize(x):
    """F.normalize(x) equivalent: L2-normalize along dim=1 (eps=1e-12)."""
    orig_shape = x.shape
    if x.ndim < 2:
        raise ValueError("normalize expects at least 2 dims (N, C, ...)")
    n, c = int(orig_shape[0]), int(orig_shape[1])
    hw = 1
    for d in orig_shape[2:]:
        hw *= int(d)
    # Collapse trailing spatial dims; metadata-only reshape, no HBM traffic.
    # The unpadded array is tiled directly -- no jnp.pad / output slice.
    x3 = x.reshape(n, c, hw)

    itemsize = jnp.dtype(x.dtype).itemsize
    vmem_cap, num_tc = _device_info()
    # ~Roofline-knee per-buffer budget (f32-equivalent); double it on v7x
    # where 3.2 TB/s HBM makes per-step overhead a larger fraction.
    per_buf_f32 = (4 << 20) if num_tc >= 2 else (2 << 20)

    bn, tile_hw = _plan_tiles(n, c, hw, num_tc, per_buf_f32)
    grid = (_cdiv(n, bn), _cdiv(hw, tile_hw))

    # Estimated per-step VMEM footprint: double-buffered in + out blocks plus
    # ~4 f32 temporaries the size of one block.
    io_bytes = bn * c * tile_hw * itemsize
    f32_bytes = bn * c * tile_hw * 4
    vmem_needed = 2 * 2 * io_bytes + 4 * f32_bytes
    if vmem_needed > min(_VMEM_HARD_CAP, vmem_cap - (4 << 20)):
        # TODO(synk): add a C-tiled (two-pass) path for channel counts whose
        # single-block footprint exceeds VMEM; not needed for typical C.
        raise ValueError(
            f"Channel dim too large for a single VMEM block "
            f"(need ~{vmem_needed >> 20} MiB); C-tiling not implemented.")
    vmem_limit = min(64 * 1024 * 1024, vmem_cap,
                     max(vmem_needed + (2 << 20), 32 * 1024 * 1024))

    block = (bn, c, tile_hw)
    spec = pl.BlockSpec(block, lambda i, j: (i, 0, j))

    cost = pl.CostEstimate(
        flops=3 * n * c * hw,              # square + reduce-add + scale
        transcendentals=n * hw,            # one rsqrt per (n, hw) column
        bytes_accessed=2 * n * c * hw * itemsize,
    )

    out3 = pl.pallas_call(
        _l2_normalize_kernel,
        out_shape=jax.ShapeDtypeStruct((n, c, hw), x.dtype),
        grid=grid,
        in_specs=[spec],
        out_specs=spec,
        compiler_params=pltpu.CompilerParams(
            dimension_semantics=("parallel", "parallel"),
            vmem_limit_bytes=int(vmem_limit),
        ),
        cost_estimate=cost,
    )(x3)

    return out3.reshape(orig_shape)


def _reference(x):
    # Pure-JAX reference matching torch.nn.functional.normalize defaults.
    xf = x.astype(jnp.float32)
    norm = jnp.sqrt(jnp.sum(xf * xf, axis=1, keepdims=True))
    return (xf / jnp.maximum(norm, EPS)).astype(x.dtype)


if __name__ == "__main__":
    key = jax.random.PRNGKey(0)
    k1, k2, k3, k4 = jax.random.split(key, 4)

    # Primary shape from the module spec (NCHW).
    x = jax.random.normal(k1, (2, 4, 16, 16), dtype=jnp.float32)
    x = x.at[:, :, 0, 0].set(0.0)   # all-zero column -> output must be 0 (eps clamp)
    out = normalize(x)
    jax.block_until_ready(out)
    assert out.shape == x.shape and out.dtype == x.dtype
    assert jnp.allclose(out, _reference(x), atol=1e-5, rtol=1e-5)

    # Ragged spatial size, single-block path (no pad / slice anywhere).
    x2 = jax.random.normal(k2, (1, 3, 7, 9), dtype=jnp.float32)
    out2 = normalize(x2)
    jax.block_until_ready(out2)
    assert out2.shape == x2.shape and out2.dtype == x2.dtype
    assert jnp.allclose(out2, _reference(x2), atol=1e-5, rtol=1e-5)

    # bf16 input: f32 accumulation + single cast must match the f32 reference.
    x3 = jax.random.normal(k3, (2, 4, 16, 16), dtype=jnp.bfloat16)
    out3 = normalize(x3)
    jax.block_until_ready(out3)
    assert out3.dtype == jnp.bfloat16
    assert jnp.allclose(out3.astype(jnp.float32),
                        _reference(x3).astype(jnp.float32),
                        atol=2e-2, rtol=2e-2)

    # Shape large enough to exercise the HW-tiled grid with a ragged,
    # masked final block (no padding, OOB lanes handled by masked stores).
    x4 = jax.random.normal(k4, (1, 4, 384, 384), dtype=jnp.float32)
    out4 = normalize(x4)
    jax.block_until_ready(out4)
    assert out4.shape == x4.shape
    assert jnp.allclose(out4, _reference(x4), atol=1e-5, rtol=1e-5)

    print("KERNEL_OK")
</pallas_src>

<mosaic_0001>
module attributes {stable_mosaic.version = 11 : i64} {
  func.func @_l2_normalize_kernel(%arg0: i32, %arg1: i32, %arg2: memref<2x4x256xf32, #tpu.memory_space<vmem>>, %arg3: memref<2x4x256xf32, #tpu.memory_space<vmem>>) attributes {dimension_semantics = [#tpu.dimension_semantics<parallel>, #tpu.dimension_semantics<parallel>], iteration_bounds = array<i64: 1, 1>, scalar_prefetch = 0 : i64, scratch_operands = 0 : i64, tpu.core_type = #tpu.core_type<tc>, window_params = [{transform_indices = @transform_0, window_bounds = array<i64: 2, 4, 256>}, {transform_indices = @transform_1, window_bounds = array<i64: 2, 4, 256>}]} {
    %c0 = arith.constant 0 : index
    %c0_0 = arith.constant 0 : index
    %c0_1 = arith.constant 0 : index
    %0 = vector.load %arg2[%c0, %c0_0, %c0_1] : memref<2x4x256xf32, #tpu.memory_space<vmem>>, vector<2x4x256xf32>
    %1 = arith.mulf %0, %0 : vector<2x4x256xf32>
    %cst = arith.constant dense<0.000000e+00> : vector<2x256xf32>
    %2 = vector.multi_reduction <add>, %1, %cst [1] : vector<2x4x256xf32> to vector<2x256xf32>
    %3 = vector.shape_cast %2 : vector<2x256xf32> to vector<2x1x256xf32>
    %4 = math.rsqrt %3 : vector<2x1x256xf32>
    %cst_2 = arith.constant 9.99999995E+11 : f32
    %5 = vector.broadcast %cst_2 : f32 to vector<2x1x256xf32>
    %6 = arith.minimumf %4, %5 : vector<2x1x256xf32>
    %7 = vector.broadcast %6 : vector<2x1x256xf32> to vector<2x4x256xf32>
    %8 = arith.mulf %0, %7 : vector<2x4x256xf32>
    %c0_3 = arith.constant 0 : index
    %c0_4 = arith.constant 0 : index
    %c0_5 = arith.constant 0 : index
    %9 = vector.load %arg3[%c0_3, %c0_4, %c0_5] : memref<2x4x256xf32, #tpu.memory_space<vmem>>, vector<2x4x256xf32>
    tpu.vector_store %arg3[%c0_3, %c0_4, %c0_5], %8 {strides = array<i32>} : memref<2x4x256xf32, #tpu.memory_space<vmem>>, vector<2x4x256xf32>,
    return
  }
  func.func @transform_0(%arg0: i32, %arg1: i32) -> (i32, i32, i32) {
    %c0_i32 = arith.constant 0 : i32
    %c0_i32_0 = arith.constant 0 : i32
    return %arg0, %c0_i32, %arg1 : i32, i32, i32
  }
  func.func @transform_1(%arg0: i32, %arg1: i32) -> (i32, i32, i32) {
    %c0_i32 = arith.constant 0 : i32
    %c0_i32_0 = arith.constant 0 : i32
    return %arg0, %c0_i32, %arg1 : i32, i32, i32
  }
}

</mosaic_0001>

<bundles_post_ra>
// kernel: tpu_custom_call.1
= control target key start
LH: loop header
LB: loop body
LE: loop exit
PB: predicated region body
PF: predicated region fallthrough
CT: control target
= control target key end

     0   :  { %6 = vsyncpa [#allocation3], 0  ;;  %s181_s0 = inlined_call_operand.hbm [shape: f32[2,4,256], index: 0, kind: input, shape index: {}]   ;;  %s182_s1 = inlined_call_operand.hbm [shape: f32[2,4,256], index: 1, kind: output, shape index: {}]  }
   0x1   :  { %7 = vsyncpa [#allocation4], 0  ;;  %s155_s6 = smov [#allocation2]  }
   0x2   :  { %s13_s7 = sshll.u32 %s155_s6, 4  ;;  %s14_s7 = int_to_ptr.vmem [resolvable:$true] %s13_s7 }
   0x3   :  { %s119_s8 = scalar_lea.vmem %s14_s7, 256  ;;  %p124_p1 = scmp.lt.s32.totalorder %s14_s7, %s14_s7 }
   0x4   :  { %p120_p0 = scmp.ne.s32.totalorder %s14_s7, %s119_s8  ;;  %p125_p2 = scmp.lt.s32.totalorder %s119_s8, %s119_s8 }
   0x6   :  { %p126_p3 = por %p125_p2, %p124_p1 }
   0x8   :  { %p127_p4 = pnand %p126_p3, %p120_p0 }
   0xa   :  { %130 = shalt.err (!%p127_p4)
}
   0xb   :  { %s156_s9 = smov 128   ;;  %s157_s10 = smov 8  }
   0xc   :  { %19 = dma.hbm_to_vmem [thread:$0]  %s181_s0, 256, %s14_s7, [#allocation3], %s156_s9, %s156_s9, %s157_s10  }
   0xd   :  { %151 = dma.done.wait [#allocation3], 256  }
   0xe   :  { %152 = vsyncadd [#allocation3], 4294967040  ;;  %v23_v0 = vld [vmem:[#allocation2] sm:$0xff]  ;;  %vm33_vm0 = vcmask 1043456   ;;  %v24_v1 = vld [vmem:[#allocation2 + $0x8] sm:$0xff]  ;;  %s158_s0 = smov [#allocation5]  }
   0xf   :  { %v25_v2 = vmul.f32 %v23_v0, %v23_v0  ;;  %v26_v3 = vmul.f32 %v24_v1, %v24_v1  ;;  %s87_s13 = sshll.u32 %s158_s0, 4  ;;  %s88_s13 = int_to_ptr.vmem [resolvable:$true] %s87_s13 }
  0x10   :  { %s131_s14 = scalar_lea.vmem %s88_s13, 256  ;;  %p136_p6 = scmp.lt.s32.totalorder %s88_s13, %s88_s13 }
  0x11   :  { %v29_v4 = vcombine.high %v25_v2, %v25_v2  ;;  %v34_v5 = vsel %vm33_vm0, %v25_v2, 0.0  ;;  %v30_v6 = vcombine.high %v26_v3, %v26_v3  ;;  %v48_v7 = vsel %vm33_vm0, %v26_v3, 0.0  ;;  %p132_p5 = scmp.ne.s32.totalorder %s88_s13, %s131_s14  ;;  %p137_p7 = scmp.lt.s32.totalorder %s131_s14, %s131_s14 }
  0x12   :  { %v35_v8 = vrot.slane %v34_v5, 4  ;;  %v49_v9 = vrot.slane %v48_v7, 4 }
  0x13   :  { %v41_v10 = vsel %vm33_vm0, %v29_v4, 0.0  ;;  %v55_v11 = vsel %vm33_vm0, %v30_v6, 0.0  ;;  %p138_p8 = por %p137_p7, %p136_p6 }
  0x14   :  { %v36_v12 = vadd.f32 %v35_v8, %v34_v5  ;;  %v42_v13 = vrot.slane %v41_v10, 4  ;;  %v50_v14 = vadd.f32 %v49_v9, %v48_v7  ;;  %v56_v15 = vrot.slane %v55_v11, 4 }
  0x15   :  { %p139_p9 = pnand %p138_p8, %p132_p5 }
  0x16   :  { %v37_v16 = vrot.slane %v36_v12, 2  ;;  %v43_v17 = vadd.f32 %v42_v13, %v41_v10  ;;  %v51_v18 = vrot.slane %v50_v14, 2  ;;  %v57_v19 = vadd.f32 %v56_v15, %v55_v11 }
  0x18   :  { %v38_v20 = vadd.f32 %v37_v16, %v36_v12  ;;  %v44_v21 = vrot.slane %v43_v17, 2  ;;  %v52_v22 = vadd.f32 %v51_v18, %v50_v14  ;;  %v58_v23 = vrot.slane %v57_v19, 2 }
  0x1a   :  { %v39_v24 = vrot.slane %v38_v20, 1  ;;  %v45_v25 = vadd.f32 %v44_v21, %v43_v17  ;;  %v53_v26 = vrot.slane %v52_v22, 1  ;;  %v59_v27 = vadd.f32 %v58_v23, %v57_v19 }
  0x1c   :  { %v40_v28 = vadd.f32 %v39_v24, %v38_v20  ;;  %v46_v29 = vrot.slane %v45_v25, 1  ;;  %v54_v30 = vadd.f32 %v53_v26, %v52_v22  ;;  %v60_v31 = vrot.slane %v59_v27, 1 }
  0x1e   :  { %v47_v32 = vadd.f32 %v46_v29, %v45_v25  ;;  %103 = vrsqrt.f32 %v40_v28  ;;  %v61_v33 = vadd.f32 %v60_v31, %v59_v27 }
  0x1f   :  { %105 = vrsqrt.f32 %v54_v30 }
  0x20   :  { %107 = vrsqrt.f32 %v47_v32 }
  0x21   :  { %109 = vrsqrt.f32 %v61_v33 }
  0x2b   :  { %v104_v34 = vpop.eup %103 }
  0x2c   :  { %v106_v35 = vpop.eup %105  ;;  %v66_v36 = vmin.f32 %v104_v34, 1e+12 }
  0x2d   :  { %v108_v37 = vpop.eup %107  ;;  %v68_v38 = vmin.f32 %v106_v35, 1e+12 }
  0x2e   :  { %v110_v39 = vpop.eup %109  ;;  %v67_v40 = vmin.f32 %v108_v37, 1e+12 }
  0x2f   :  { %v69_v41 = vmin.f32 %v110_v39, 1e+12 }
  0x30   :  { %v74_v42 = vcombine.low %v66_v36, %v67_v40 }
  0x31   :  { %v75_v43 = vcombine.low %v68_v38, %v69_v41 }
  0x32   :  { %v78_v44 = vmul.f32 %v74_v42, %v23_v0 }
  0x33   :  { %v79_v45 = vmul.f32 %v75_v43, %v24_v1 }
  0x34   :  { %80 = vst [vmem:[#allocation5] sm:$0xff] %v78_v44 }
  0x35   :  { %81 = vst [vmem:[#allocation5 + $0x8] sm:$0xff] %v79_v45 }
  0x36   :  { %142 = shalt.err (!%p139_p9)
}
  0x37   :  { %93 = dma.vmem_to_hbm [thread:$0]  %s88_s13, 256, %s182_s1, [#allocation4], %s156_s9, %s156_s9, %s157_s10  }
  0x38   :  { %153 = dma.done.wait [#allocation4], 256  }
  0x39   :  { %154 = vsyncadd [#allocation4], 4294967040 }
  0x3a   :  { %97 = vsyncpa [#allocation3], 1 }
  0x3b   :  { %98 = vsyncpa [#allocation4], 1 }

</bundles_post_ra>
